<compile_context>
chip_gen: v7x
topology: tpu7x:2x2x1
jax: 0.10.0
libtpu: 0.0.40
codegen_flags: <defaults>
</compile_context>

<pallas_src>
import jax
import jax.numpy as jnp
from jax.experimental import pallas as pl
from jax.experimental.pallas import tpu as pltpu


# ----------------------------- kernel -----------------------------------------


def gcn_agg_kernel(hn_ref, wt_ref, a_ref, b_ref, o_ref, xw_ref):
    """Fused GCN layer: out[i-blk] = ReLU( sum_k A_hat[i,k] @ (hn @ W^T)[k] + b ).

    Grid = (row blocks i, reduction blocks k). hn, W^T and bias are fully
    VMEM-resident; XW = hn @ W^T is recomputed into the bf16 VMEM scratch at k == 0
    of each row block (cheap: K = F_in is tiny; scratch is per-core, so this stays
    correct when the 'parallel' row axis is sharded across TensorCores). The f32
    output block is resident across k and accumulated into directly.
    """
    k = pl.program_id(1)
    tk = a_ref.shape[1]

    @pl.when(k == 0)
    def _():
        xw = jnp.dot(hn_ref[...], wt_ref[...], preferred_element_type=jnp.float32)
        xw_ref[...] = xw.astype(xw_ref.dtype)
        o_ref[...] = jnp.zeros_like(o_ref)

    start = pl.multiple_of(k * tk, tk)
    xw_blk = xw_ref[pl.ds(start, tk), :]
    o_ref[...] += jnp.dot(a_ref[...], xw_blk, preferred_element_type=jnp.float32)

    @pl.when(k == pl.num_programs(1) - 1)
    def _():
        # Bias + ReLU once, in f32, in place. Padded rows become ReLU(bias) and are
        # sliced away in the wrapper.
        o_ref[...] = jnp.maximum(o_ref[...] + b_ref[...], 0.0)


# ----------------------------- wrapper -----------------------------------------


def _round_up(x, m):
    return ((x + m - 1) // m) * m


def _pick_tile(n_pad, target):
    """Largest power-of-two-ish tile <= target that divides n_pad (n_pad % 128 == 0)."""
    t = max(8, min(target, n_pad))
    while n_pad % t != 0:
        t //= 2
    return t


def build_norm_adj_padded(edge_index, num_nodes, n_pad, dtype=jnp.bfloat16):
    """D^{-1/2}(A+I)D^{-1/2}, built directly at padded size in the kernel's stream
    dtype. Degree / norm math stays f32; only the final dense scatter is quantized."""
    row, col = edge_index[0], edge_index[1]
    loop = jnp.arange(num_nodes, dtype=edge_index.dtype)
    row = jnp.concatenate([row, loop])
    col = jnp.concatenate([col, loop])
    ew = jnp.ones(row.shape[0], jnp.float32)
    deg = jnp.zeros((num_nodes,), jnp.float32).at[col].add(ew)
    deg_inv_sqrt = jnp.where(deg > 0, deg ** -0.5, 0.0)
    norm = deg_inv_sqrt[row] * ew * deg_inv_sqrt[col]
    # out[i] = sum_{e: col[e]==i} norm[e] * x[row[e]]  =>  A_hat[col, row] += norm
    return jnp.zeros((n_pad, n_pad), dtype).at[col, row].add(norm.astype(dtype))


def gcn_forward(edge_index, hn, w, bias, he):
    """edge_index [2,E] int32, hn [N,F_in], w [F_out,F_in], bias [F_out], he [E,D_e]."""
    n, f_in = hn.shape
    f_out = w.shape[0]

    # Lane-dense padded sizes (unmasked vst on the output, full-width MXU tiles).
    n_pad = _round_up(max(n, 128), 128)
    f_pad = _round_up(max(f_out, 128), 128)

    # Tiles: large, but keep >= 2 row blocks so v7x's two TensorCores both get work;
    # tk as large as possible (amortizes the fixed per-k-step f32 output RMW --
    # matters most on v5e's single vector-store slot).
    tm = _pick_tile(n_pad, min(512, max(n_pad // 2, 8)))
    tk = _pick_tile(n_pad, 2048)

    # A_hat built directly at padded size in bf16 -- no extra N^2 pad+cast pass.
    a_p = build_norm_adj_padded(edge_index, n, n_pad, jnp.bfloat16)
    hn_p = jnp.pad(hn.astype(jnp.float32), ((0, n_pad - n), (0, 0)))
    wt_p = jnp.pad(w.T.astype(jnp.float32), ((0, 0), (0, f_pad - f_out)))
    b_p = jnp.pad(bias.astype(jnp.float32), (0, f_pad - f_out)).reshape(1, f_pad)

    # VMEM footprint (double-buffered streams + resident operands + scratch).
    vmem_bytes = (
        2 * tm * tk * 2          # A_hat blocks (bf16, double-buffered)
        + 2 * tm * f_pad * 4     # output blocks (f32, double-buffered)
        + n_pad * f_pad * 2      # XW scratch (bf16, on-chip only)
        + 2 * n_pad * f_in * 4   # hn (resident)
        + 2 * f_in * f_pad * 4   # W^T (resident)
        + 2 * f_pad * 4          # bias (resident)
    )
    vmem_limit = max(32 * 1024 * 1024,
                     min(int(vmem_bytes * 5 // 4), 56 * 1024 * 1024))

    out_p = pl.pallas_call(
        gcn_agg_kernel,
        out_shape=jax.ShapeDtypeStruct((n_pad, f_pad), jnp.float32),
        grid=(n_pad // tm, n_pad // tk),
        in_specs=[
            pl.BlockSpec((n_pad, f_in), lambda i, k: (0, 0)),   # hn   (f32, resident)
            pl.BlockSpec((f_in, f_pad), lambda i, k: (0, 0)),   # W^T  (f32, resident)
            pl.BlockSpec((tm, tk), lambda i, k: (i, k)),        # A_hat stream (bf16)
            pl.BlockSpec((1, f_pad), lambda i, k: (0, 0)),      # bias (f32, resident)
        ],
        out_specs=pl.BlockSpec((tm, f_pad), lambda i, k: (i, 0)),
        scratch_shapes=[pltpu.VMEM((n_pad, f_pad), jnp.bfloat16)],  # XW, never in HBM
        compiler_params=pltpu.CompilerParams(
            dimension_semantics=("parallel", "arbitrary"),
            vmem_limit_bytes=vmem_limit,
        ),
    )(hn_p, wt_p, a_p, b_p)

    out = out_p[:n, :f_out]

    # API parity with `+ 0 * data.he.mean()`: exactly zero, but propagates NaN/Inf
    # like the reference. Done in the wrapper -- he never enters the kernel.
    return out + 0.0 * jnp.mean(he.astype(jnp.float32))


# ------------------------- plain-JAX references --------------------------------


def build_norm_adj_f32(edge_index, num_nodes):
    """Dense unpadded f32 D^{-1/2}(A+I)D^{-1/2} (reference only)."""
    row, col = edge_index[0], edge_index[1]
    loop = jnp.arange(num_nodes, dtype=edge_index.dtype)
    row = jnp.concatenate([row, loop])
    col = jnp.concatenate([col, loop])
    ew = jnp.ones(row.shape[0], jnp.float32)
    deg = jnp.zeros((num_nodes,), jnp.float32).at[col].add(ew)
    deg_inv_sqrt = jnp.where(deg > 0, deg ** -0.5, 0.0)
    norm = deg_inv_sqrt[row] * ew * deg_inv_sqrt[col]
    return jnp.zeros((num_nodes, num_nodes), jnp.float32).at[col, row].add(norm)


def ref_forward_f32(a_hat, hn, w, bias, he):
    out = a_hat @ (hn @ w.T) + bias[None, :]
    return jnp.maximum(out, 0.0) + 0.0 * jnp.mean(he)


def ref_forward_bf16(a_hat, hn, w, bias, he):
    """Reference matching the kernel's bf16 operand streams (f32 accumulate)."""
    xw = (hn @ w.T).astype(jnp.bfloat16).astype(jnp.float32)
    a = a_hat.astype(jnp.bfloat16).astype(jnp.float32)
    out = a @ xw + bias[None, :]
    return jnp.maximum(out, 0.0) + 0.0 * jnp.mean(he)


# ----------------------------------- main ---------------------------------------


if __name__ == "__main__":
    key = jax.random.PRNGKey(0)
    k_x, k_e, k_w, k_b, k_he = jax.random.split(key, 5)

    N = 16        # number of nodes
    F_IN = 16     # irreps_input.dim
    F_OUT = 32    # irreps_output.dim
    E = 40        # number of edges
    D_E = 4       # edge-feature dim (data.he)

    hn = jax.random.normal(k_x, (N, F_IN), jnp.float32)
    edge_index = jax.random.randint(k_e, (2, E), 0, N, dtype=jnp.int32)
    he = jax.random.normal(k_he, (E, D_E), jnp.float32)

    # Glorot-like W; small random bias to exercise the bias path.
    lim = (6.0 / (F_IN + F_OUT)) ** 0.5
    w = jax.random.uniform(k_w, (F_OUT, F_IN), jnp.float32, -lim, lim)
    bias = 0.1 * jax.random.normal(k_b, (F_OUT,), jnp.float32)

    out = gcn_forward(edge_index, hn, w, bias, he)
    out = jax.block_until_ready(out)

    assert out.shape == (N, F_OUT)

    a_hat_f32 = build_norm_adj_f32(edge_index, N)
    ref_q = ref_forward_bf16(a_hat_f32, hn, w, bias, he)
    ref_f = ref_forward_f32(a_hat_f32, hn, w, bias, he)
    assert jnp.allclose(out, ref_q, atol=1e-2, rtol=1e-2)
    assert jnp.allclose(out, ref_f, atol=3e-2, rtol=3e-2)

    print("KERNEL_OK")
</pallas_src>

<mosaic_0001>
module attributes {stable_mosaic.version = 11 : i64} {
  func.func @gcn_agg_kernel(%arg0: i32, %arg1: i32, %arg2: memref<128x16xf32, #tpu.memory_space<vmem>>, %arg3: memref<16x128xf32, #tpu.memory_space<vmem>>, %arg4: memref<64x128xbf16, #tpu.memory_space<vmem>>, %arg5: memref<1x128xf32, #tpu.memory_space<vmem>>, %arg6: memref<64x128xf32, #tpu.memory_space<vmem>>, %arg7: memref<128x128xbf16, #tpu.memory_space<vmem>>) attributes {dimension_semantics = [#tpu.dimension_semantics<parallel>, #tpu.dimension_semantics<arbitrary>], iteration_bounds = array<i64: 2, 1>, scalar_prefetch = 0 : i64, scratch_operands = 1 : i64, tpu.core_type = #tpu.core_type<tc>, window_params = [{pipeline_mode = #tpu.pipeline_mode<synchronous>, transform_indices = @transform_0, window_bounds = array<i64: 128, 16>}, {pipeline_mode = #tpu.pipeline_mode<synchronous>, transform_indices = @transform_1, window_bounds = array<i64: 16, 128>}, {transform_indices = @transform_2, window_bounds = array<i64: 64, 128>}, {pipeline_mode = #tpu.pipeline_mode<synchronous>, transform_indices = @transform_3, window_bounds = array<i64: 1, 128>}, {transform_indices = @transform_4, window_bounds = array<i64: 64, 128>}]} {
    %c0_i32 = arith.constant 0 : i32
    %0 = arith.cmpi eq, %arg1, %c0_i32 : i32
    %1 = arith.extui %0 : i1 to i32
    %c0_i32_0 = arith.constant 0 : i32
    %2 = arith.cmpi ne, %1, %c0_i32_0 : i32
    scf.if %2 {
      %c0_9 = arith.constant 0 : index
      %c0_10 = arith.constant 0 : index
      %15 = vector.load %arg2[%c0_9, %c0_10] : memref<128x16xf32, #tpu.memory_space<vmem>>, vector<128x16xf32>
      %c0_11 = arith.constant 0 : index
      %c0_12 = arith.constant 0 : index
      %16 = vector.load %arg3[%c0_11, %c0_12] : memref<16x128xf32, #tpu.memory_space<vmem>>, vector<16x128xf32>
      %cst_13 = arith.constant dense<0.000000e+00> : vector<128x128xf32>
      %17 = tpu.matmul %15, %16, %cst_13 {dimension_numbers = #tpu.dot_dimension_numbers<[1], [0], [0], [1], [0, 0, 1, 1], [], []>} : vector<128x16xf32>, vector<16x128xf32>, vector<128x128xf32> -> vector<128x128xf32>
      %18 = arith.truncf %17 : vector<128x128xf32> to vector<128x128xbf16>
      %c0_14 = arith.constant 0 : index
      %c0_15 = arith.constant 0 : index
      %19 = vector.load %arg7[%c0_14, %c0_15] : memref<128x128xbf16, #tpu.memory_space<vmem>>, vector<128x128xbf16>
      tpu.vector_store %arg7[%c0_14, %c0_15], %18 {strides = array<i32>} : memref<128x128xbf16, #tpu.memory_space<vmem>>, vector<128x128xbf16>,
      %cst_16 = arith.constant 0.000000e+00 : f32
      %20 = vector.broadcast %cst_16 : f32 to vector<64x128xf32>
      %c0_17 = arith.constant 0 : index
      %c0_18 = arith.constant 0 : index
      %21 = vector.load %arg6[%c0_17, %c0_18] : memref<64x128xf32, #tpu.memory_space<vmem>>, vector<64x128xf32>
      tpu.vector_store %arg6[%c0_17, %c0_18], %20 {strides = array<i32>} : memref<64x128xf32, #tpu.memory_space<vmem>>, vector<64x128xf32>,
    } else {
    }
    %c128_i32 = arith.constant 128 : i32
    %3 = arith.muli %arg1, %c128_i32 : i32
    %4 = tpu.assume_multiple %3, 128 : i32
    %5 = arith.index_cast %4 : i32 to index
    %c0 = arith.constant 0 : index
    %6 = vector.load %arg7[%5, %c0] : memref<128x128xbf16, #tpu.memory_space<vmem>>, vector<128x128xbf16>
    %c0_1 = arith.constant 0 : index
    %c0_2 = arith.constant 0 : index
    %7 = vector.load %arg6[%c0_1, %c0_2] : memref<64x128xf32, #tpu.memory_space<vmem>>, vector<64x128xf32>
    %c0_3 = arith.constant 0 : index
    %c0_4 = arith.constant 0 : index
    %8 = vector.load %arg4[%c0_3, %c0_4] : memref<64x128xbf16, #tpu.memory_space<vmem>>, vector<64x128xbf16>
    %cst = arith.constant dense<0.000000e+00> : vector<64x128xf32>
    %9 = tpu.matmul %8, %6, %cst {dimension_numbers = #tpu.dot_dimension_numbers<[1], [0], [0], [1], [0, 0, 1, 1], [], []>} : vector<64x128xbf16>, vector<128x128xbf16>, vector<64x128xf32> -> vector<64x128xf32>
    %10 = arith.addf %7, %9 : vector<64x128xf32>
    %c0_5 = arith.constant 0 : index
    %c0_6 = arith.constant 0 : index
    %11 = vector.load %arg6[%c0_5, %c0_6] : memref<64x128xf32, #tpu.memory_space<vmem>>, vector<64x128xf32>
    tpu.vector_store %arg6[%c0_5, %c0_6], %10 {strides = array<i32>} : memref<64x128xf32, #tpu.memory_space<vmem>>, vector<64x128xf32>,
    %c0_i32_7 = arith.constant 0 : i32
    %12 = arith.cmpi eq, %arg1, %c0_i32_7 : i32
    %13 = arith.extui %12 : i1 to i32
    %c0_i32_8 = arith.constant 0 : i32
    %14 = arith.cmpi ne, %13, %c0_i32_8 : i32
    scf.if %14 {
      %c0_9 = arith.constant 0 : index
      %c0_10 = arith.constant 0 : index
      %15 = vector.load %arg6[%c0_9, %c0_10] : memref<64x128xf32, #tpu.memory_space<vmem>>, vector<64x128xf32>
      %c0_11 = arith.constant 0 : index
      %c0_12 = arith.constant 0 : index
      %16 = vector.load %arg5[%c0_11, %c0_12] : memref<1x128xf32, #tpu.memory_space<vmem>>, vector<1x128xf32>
      %17 = vector.broadcast %16 : vector<1x128xf32> to vector<64x128xf32>
      %18 = arith.addf %15, %17 : vector<64x128xf32>
      %cst_13 = arith.constant 0.000000e+00 : f32
      %19 = vector.broadcast %cst_13 : f32 to vector<64x128xf32>
      %20 = arith.maximumf %18, %19 : vector<64x128xf32>
      %c0_14 = arith.constant 0 : index
      %c0_15 = arith.constant 0 : index
      %21 = vector.load %arg6[%c0_14, %c0_15] : memref<64x128xf32, #tpu.memory_space<vmem>>, vector<64x128xf32>
      tpu.vector_store %arg6[%c0_14, %c0_15], %20 {strides = array<i32>} : memref<64x128xf32, #tpu.memory_space<vmem>>, vector<64x128xf32>,
    } else {
    }
    return
  }
  func.func @transform_0(%arg0: i32, %arg1: i32) -> (i32, i32) {
    %c0_i32 = arith.constant 0 : i32
    %c0_i32_0 = arith.constant 0 : i32
    %c0_i32_1 = arith.constant 0 : i32
    return %c0_i32, %c0_i32_0 : i32, i32
  }
  func.func @transform_1(%arg0: i32, %arg1: i32) -> (i32, i32) {
    %c0_i32 = arith.constant 0 : i32
    %c0_i32_0 = arith.constant 0 : i32
    %c0_i32_1 = arith.constant 0 : i32
    return %c0_i32, %c0_i32_0 : i32, i32
  }
  func.func @transform_2(%arg0: i32, %arg1: i32) -> (i32, i32) {
    %c0_i32 = arith.constant 0 : i32
    return %arg0, %arg1 : i32, i32
  }
  func.func @transform_3(%arg0: i32, %arg1: i32) -> (i32, i32) {
    %c0_i32 = arith.constant 0 : i32
    %c0_i32_0 = arith.constant 0 : i32
    %c0_i32_1 = arith.constant 0 : i32
    return %c0_i32, %c0_i32_0 : i32, i32
  }
  func.func @transform_4(%arg0: i32, %arg1: i32) -> (i32, i32) {
    %c0_i32 = arith.constant 0 : i32
    %c0_i32_0 = arith.constant 0 : i32
    return %arg0, %c0_i32 : i32, i32
  }
}

</mosaic_0001>

<bundles_post_ra>
// kernel: tpu_custom_call.1
= control target key start
LH: loop header
LB: loop body
LE: loop exit
PB: predicated region body
PF: predicated region fallthrough
CT: control target
= control target key end

     0   :  { %9 = vsyncpa [#allocation4], 0  ;;  %s1232_s0 = inlined_call_operand.vmem [shape: f32[128,16], index: 0, kind: input, shape index: {}]   ;;  %s1233_s1 = inlined_call_operand.vmem [shape: f32[16,128], index: 1, kind: input, shape index: {}]   ;;  %s1234_s2 = inlined_call_operand.vmem [shape: bf16[128,128], index: 2, kind: input, shape index: {}]   ;;  %s1235_s3 = inlined_call_operand.vmem [shape: f32[1,128], index: 3, kind: input, shape index: {}]   ;;  %s1236_s4 = inlined_call_operand.hbm [shape: f32[128,128], index: 4, kind: output, shape index: {}]  }
   0x1   :  { %11 = vsyncpa [#allocation4 + $0x1], 0  ;;  %s1035_s15 = smov 0   ;;  %s1037_s16 = smov 0  }
   0x2   :  { %s1039_s17 = smov 0   ;;  %s1041_s18 = smov 0  }
   0x3   :  { %s1043_s19 = smov 0   ;;  %s1045_s20 = smov 0  }
   0x4 LB: > { %s728_s21 = sadd.s32 4294967295, %s1005_s20   ;;  %s729_s22 = sadd.s32 4294967294, %s1005_s20   ;;  %s1005_s20 = sphi %s1045_s20, %s17_s20   ;;  %s1001_s19 = sphi %s1043_s19, %s1243_s19   ;;  %s997_s18 = sphi %s1041_s18, %s1242_s18   ;;  %s993_s17 = sphi %s1039_s17, %s1241_s17   ;;  %s989_s16 = sphi %s1037_s16, %s1240_s16   ;;  %s985_s15 = sphi %s1035_s15, %s1239_s15  }
   0x5   : > { %s29_s23 = sadd.s32 1, %s1001_s19  ;;  %s127_s24 = sadd.s32 1, %s993_s17 }
   0x6   : > { %p31_p0 = scmp.ge.s32.totalorder %s29_s23, 2  ;;  %p137_p1 = scmp.ne.s32.totalorder %s993_s17, %s989_s16 }
   0x7   : > { %p138_p2 = scmp.eq.s32.totalorder %s728_s21, 1  ;;  %p143_p3 = scmp.ne.s32.totalorder %s989_s16, %s985_s15 }
   0x8   : > { %s1245_s23 = smov (%p31_p0, %s29_s23), 0  ;;  %p144_p5 = scmp.eq.s32.totalorder %s729_s22, 1 }
   0x9   : > { %p1075_p4 = por %p138_p2, %p137_p1  ;;  %s124_s26 = ssub.s32 %s1001_s19, %s1245_s23 }
   0xa   : > { %p732_p6 = scmp.ge.s32.totalorder %s1005_s20, 1  ;;  %p125_p7 = scmp.eq.s32.totalorder %s124_s26, 0 }
   0xb   : > { %p1082_p8 = por %p144_p5, %p143_p3  ;;  %p183_p9 = scmp.lt.s32.totalorder %s1005_s20, 3 }
   0xc   : > { %s1088_s28 = scalar_select %p125_p7, %s993_s17, %s127_s24  }
   0xd   : > { %p184_p10 = pnand %p732_p6, %p183_p9 }
   0xe   : > { %v243_v0 = vld [vmem:[%s1233_s1] sm:$0xff] (!%p184_p10)  ;;  %v244_v1 = vld [vmem:[%s1233_s1 + $0x8] sm:$0xff] (!%p184_p10)  ;;  %vm245_vm0 = vcmask (!%p184_p10), 130048   ;;  %v229_v5 = vld [vmem:[%s1232_s0 + $0x10] sm:$0xff] (!%p184_p10)  ;;  %s734_s7 = sshll.u32 (!%p184_p10), %s997_s18, 3  ;;  %s209_s12 = sand.u32 (!%p184_p10), 1, %s989_s16  }
   0xf   : > { %187 = sbr.rel (%p184_p10) target bundleno = 502 (0x1f6), region = 36  ;;  %v227_v2 = vld [vmem:[%s1232_s0] sm:$0xff] (!%p184_p10)  ;;  %v845_v3 = vpack.c.bf16 (!%p184_p10), %v244_v1, %v243_v0  ;;  %v228_v4 = vld [vmem:[%s1232_s0 + $0x8] sm:$0xff] (!%p184_p10)  ;;  %v230_v6 = vld [vmem:[%s1232_s0 + $0x18] sm:$0xff] (!%p184_p10)  ;;  %p213_p11 = scmp.lt.s32.totalorder (!%p184_p10), %s734_s7, 15 }
  0x10   : > { %797 = vmatprep.mubr.msk.f32.mxu0 (!%p184_p10), %vm245_vm0, %v227_v2  ;;  %v231_v7 = vld [vmem:[%s1232_s0 + $0x20] sm:$0xff] (!%p184_p10)  ;;  %v232_v8 = vld [vmem:[%s1232_s0 + $0x28] sm:$0xff] (!%p184_p10)  ;;  %v233_v9 = vld [vmem:[%s1232_s0 + $0x30] sm:$0xff] (!%p184_p10)  ;;  %s733_s13 = sshll.u32 (!%p184_p10), %s209_s12, 6  ;;  %s762_s22 = sshll.u32 (!%p184_p10), %s997_s18, 10 }
  0x11   : > { %846 = vmatprep.subr.bf16.mxu0 (!%p184_p10), %v845_v3  ;;  %v234_v10 = vld [vmem:[%s1232_s0 + $0x38] sm:$0xff] (!%p184_p10)  ;;  %v235_v11 = vld [vmem:[%s1232_s0 + $0x40] sm:$0xff] (!%p184_p10)  ;;  %v236_v12 = vld [vmem:[%s1232_s0 + $0x48] sm:$0xff] (!%p184_p10)  ;;  %s211_s24 = scalar_lea.vmem (!%p184_p10), [#allocation3], %s733_s13  ;;  %s1180_s18 = scalar_lea.hbm (!%p184_p10), %s1236_s4, %s762_s22 }
  0x12   : > { %848 = vmatpush3.bf16.msra.mxu0 (!%p184_p10), %v845_v3  ;;  %v237_v13 = vld [vmem:[%s1232_s0 + $0x50] sm:$0xff] (!%p184_p10)  ;;  %v238_v14 = vld [vmem:[%s1232_s0 + $0x58] sm:$0xff] (!%p184_p10)  ;;  %v239_v15 = vld [vmem:[%s1232_s0 + $0x60] sm:$0xff] (!%p184_p10)  ;;  %s653_s26 = sshll.u32 (!%p184_p10), %s211_s24, 4  ;;  %s1186_s5 = scalar_lea.sflag (!%p184_p10), [#allocation4], %s209_s12  ;;  %s1182_s26 = int_to_ptr.vmem [resolvable:$true] %s653_s26 }
  0x13   : > { %v240_v16 = vld [vmem:[%s1232_s0 + $0x68] sm:$0xff] (!%p184_p10)  ;;  %v241_v17 = vld [vmem:[%s1232_s0 + $0x70] sm:$0xff] (!%p184_p10)  ;;  %v242_v18 = vld [vmem:[%s1232_s0 + $0x78] sm:$0xff] (!%p184_p10)  ;;  %s927_s6 = scalar_lea.vmem (!%p184_p10), %s1182_s26, 1024 }
  0x14   : > { %v756_v48 = vld [vmem:[%s1235_s3] ss:$0 sm:$0xff] (!%p184_p10)  ;;  %p928_p12 = scmp.ne.s32.totalorder (!%p184_p10), %s1182_s26, %s927_s6 }
  0x15   : > { %798 = vmatmul.mubr.msk.f32.vlgmr.msra.gmra.mrb[0].mxu0 (!%p184_p10), %vm245_vm0, %v228_v4 }
  0x16   : > { %800 = vmatprep.mubr.msk.f32.mxu0 %vm245_vm0, %v229_v5  ;;  %s1247_s7 = smov (!%p213_p11, %s734_s7), 15  ;;  %p929_p13 = pnand %p928_p12, %p1075_p4 }
  0x17   : > { %s735_s8 = sshll.u32 %s1247_s7, 2  ;;  %s1007_s7 = smov [#allocation3]  }
  0x18   : > { %s1164_s11 = scalar_lea.vmem %s1234_s2, %s735_s8  ;;  %p930_p0 = pneg %p929_p13 }
  0x19   : > { %801 = vmatmul.mubr.msk.f32.gmra.mrb[2].mxu0 %vm245_vm0, %v230_v6  ;;  %v923_v19 = vld [vmem:[%s1164_s11] sm:$0xff]   ;;  %v924_v20 = vld [vmem:[%s1164_s11 + $0x10] sm:$0xff]   ;;  %v925_v45 = vld [vmem:[%s1164_s11 + $0x8] sm:$0xff]   ;;  %s931_s8 = sshll.u32 %s1007_s7, 4  ;;  %s932_s8 = int_to_ptr.vmem [resolvable:$false] %s931_s8 }
  0x1a   : > { %803 = vmatprep.mubr.msk.f32.mxu0 %vm245_vm0, %v231_v7  ;;  %841 = vmatprep.mubr.bf16.mxu1 %v924_v20  ;;  %v926_v46 = vld [vmem:[%s1164_s11 + $0x18] sm:$0xff]   ;;  %s933_s9 = scalar_lea.vmem %s932_s8, 2048  ;;  %p934_p1 = scmp.lt.s32.totalorder %s1182_s26, %s932_s8 }
  0x1b   : > { %p935_p2 = scmp.lt.s32.totalorder %s933_s9, %s927_s6 }
  0x1d   : > { %804 = vmatmul.mubr.msk.f32.gmra.mrb[4].mxu0 %vm245_vm0, %v232_v8  ;;  %p936_p3 = por %p935_p2, %p934_p1 }
  0x1e   : > { %806 = vmatprep.mubr.msk.f32.mxu0 %vm245_vm0, %v233_v9 }
  0x1f   : > { %p937_p5 = pnand %p936_p3, %p930_p0 }
  0x21   : > { %807 = vmatmul.mubr.msk.f32.gmra.mrb[6].mxu0 %vm245_vm0, %v234_v10 }
  0x22   : > { %809 = vmatprep.mubr.msk.f32.mxu0 %vm245_vm0, %v235_v11 }
  0x25   : > { %810 = vmatmul.mubr.msk.f32.gmra.mrb[8].mxu0 %vm245_vm0, %v236_v12 }
  0x26   : > { %812 = vmatprep.mubr.msk.f32.mxu0 %vm245_vm0, %v237_v13 }
  0x29   : > { %813 = vmatmul.mubr.msk.f32.gmra.mrb[10].mxu0 %vm245_vm0, %v238_v14 }
  0x2a   : > { %815 = vmatprep.mubr.msk.f32.mxu0 %vm245_vm0, %v239_v15 }
  0x2d   : > { %816 = vmatmul.mubr.msk.f32.gmra.mrb[12].mxu0 %vm245_vm0, %v240_v16 }
  0x2e   : > { %818 = vmatprep.mubr.msk.f32.mxu0 %vm245_vm0, %v241_v17 }
  0x31   : > { %819 = vmatmul.mubr.msk.f32.gmra.mrb[14].mxu0 %vm245_vm0, %v242_v18 }
  0x32   : > { %837 = vmatprep.mubr.bf16.mxu0 %v923_v19 }
  0xe8   : > { %v799_v21 = vpop.f32.mrb[0].mxu0 }
  0xe9   : > { %v360_v22 = vpop.f32.mrb[1].mxu0 }
  0xea   : > { %v439_v23 = vpack.c.bf16 %v799_v21, %v360_v22 }
  0xec   : > { %v802_v24 = vpop.f32.mrb[2].mxu0  ;;  %821 = vmatprep.subr.bf16.mxu0 %v439_v23  ;;  %849 = vmatprep.subr.bf16.mxu1 %v439_v23 }
  0xed   : > { %v370_v25 = vpop.f32.mrb[3].mxu0  ;;  %822 = vmatpush3.bf16.msra.mxu0 %v439_v23  ;;  %857 = vmatpush3.bf16.msra.mxu1 %v439_v23 }
  0xee   : > { %v440_v26 = vpack.c.bf16 %v802_v24, %v370_v25 }
  0xf0   : > { %v805_v27 = vpop.f32.mrb[4].mxu0  ;;  %823 = vmatprep.subr.bf16.mxu0 %v440_v26  ;;  %850 = vmatprep.subr.bf16.mxu1 %v440_v26 }
  0xf1   : > { %v380_v28 = vpop.f32.mrb[5].mxu0  ;;  %824 = vmatpush3.bf16.msra.mxu0 %v440_v26  ;;  %858 = vmatpush3.bf16.msra.mxu1 %v440_v26 }
  0xf2   : > { %v441_v29 = vpack.c.bf16 %v805_v27, %v380_v28 }
  0xf4   : > { %v808_v30 = vpop.f32.mrb[6].mxu0  ;;  %825 = vmatprep.subr.bf16.mxu0 %v441_v29  ;;  %851 = vmatprep.subr.bf16.mxu1 %v441_v29 }
  0xf5   : > { %v390_v31 = vpop.f32.mrb[7].mxu0  ;;  %826 = vmatpush3.bf16.msra.mxu0 %v441_v29  ;;  %859 = vmatpush3.bf16.msra.mxu1 %v441_v29 }
  0xf6   : > { %v442_v32 = vpack.c.bf16 %v808_v30, %v390_v31 }
  0xf8   : > { %v811_v33 = vpop.f32.mrb[8].mxu0  ;;  %827 = vmatprep.subr.bf16.mxu0 %v442_v32  ;;  %852 = vmatprep.subr.bf16.mxu1 %v442_v32 }
  0xf9   : > { %v400_v34 = vpop.f32.mrb[9].mxu0  ;;  %828 = vmatpush3.bf16.msra.mxu0 %v442_v32  ;;  %860 = vmatpush3.bf16.msra.mxu1 %v442_v32 }
  0xfa   : > { %v443_v35 = vpack.c.bf16 %v811_v33, %v400_v34 }
  0xfc   : > { %v814_v36 = vpop.f32.mrb[10].mxu0  ;;  %829 = vmatprep.subr.bf16.mxu0 %v443_v35  ;;  %853 = vmatprep.subr.bf16.mxu1 %v443_v35 }
  0xfd   : > { %v410_v37 = vpop.f32.mrb[11].mxu0  ;;  %830 = vmatpush3.bf16.msra.mxu0 %v443_v35  ;;  %861 = vmatpush3.bf16.msra.mxu1 %v443_v35 }
  0xfe   : > { %v444_v38 = vpack.c.bf16 %v814_v36, %v410_v37 }
 0x100   : > { %v817_v39 = vpop.f32.mrb[12].mxu0  ;;  %831 = vmatprep.subr.bf16.mxu0 %v444_v38  ;;  %854 = vmatprep.subr.bf16.mxu1 %v444_v38 }
 0x101   : > { %v420_v40 = vpop.f32.mrb[13].mxu0  ;;  %832 = vmatpush3.bf16.msra.mxu0 %v444_v38  ;;  %862 = vmatpush3.bf16.msra.mxu1 %v444_v38 }
 0x102   : > { %v445_v41 = vpack.c.bf16 %v817_v39, %v420_v40 }
 0x104   : > { %v820_v42 = vpop.f32.mrb[14].mxu0  ;;  %833 = vmatprep.subr.bf16.mxu0 %v445_v41  ;;  %855 = vmatprep.subr.bf16.mxu1 %v445_v41 }
 0x105   : > { %v430_v43 = vpop.f32.mrb[15].mxu0  ;;  %834 = vmatpush3.bf16.msra.mxu0 %v445_v41  ;;  %863 = vmatpush3.bf16.msra.mxu1 %v445_v41 }
 0x106   : > { %v446_v44 = vpack.c.bf16 %v820_v42, %v430_v43 }
 0x108   : > { %835 = vmatprep.subr.bf16.mxu0 %v446_v44  ;;  %856 = vmatprep.subr.bf16.mxu1 %v446_v44 }
 0x109   : > { %836 = vmatpush3.bf16.msra.mxu0 %v446_v44  ;;  %864 = vmatpush3.bf16.msra.mxu1 %v446_v44 }
 0x10c   : > { %838 = vmatmul.mubr.bf16.vlgmr.msra.gmra.mrb[16].mxu0 %v925_v45  ;;  %842 = vmatmul.mubr.bf16.vlgmr.msra.gmra.mrb[0].mxu1 %v926_v46 }
 0x1df   : > { %v839_v47 = vpop.f32.mrb[16].mxu0  ;;  %v843_v49 = vpop.f32.mrb[0].mxu1 }
 0x1e0   : > { %v550_v50 = vpop.f32.mrb[17].mxu0  ;;  %v566_v51 = vpop.f32.mrb[1].mxu1  ;;  %v617_v54 = vadd.f32 %v839_v47, %v756_v48  ;;  %v621_v55 = vadd.f32 %v843_v49, %v756_v48 }
 0x1e1   : > { %v840_v52 = vpop.f32.mrb[18].mxu0  ;;  %v844_v53 = vpop.f32.mrb[2].mxu1  ;;  %v615_v58 = vadd.f32 %v756_v48, %v550_v50  ;;  %v619_v59 = vadd.f32 %v756_v48, %v566_v51 }
 0x1e2   : > { %v553_v56 = vpop.f32.mrb[19].mxu0  ;;  %v569_v57 = vpop.f32.mrb[3].mxu1  ;;  %v625_v60 = vmax.f32 %v617_v54, 0.0  ;;  %v629_v61 = vmax.f32 %v621_v55, 0.0  ;;  %v618_v62 = vadd.f32 %v840_v52, %v756_v48  ;;  %v622_v63 = vadd.f32 %v844_v53, %v756_v48 }
 0x1e3   : > { %v623_v0 = vmax.f32 %v615_v58, 0.0  ;;  %v627_v1 = vmax.f32 %v619_v59, 0.0  ;;  %v616_v2 = vadd.f32 %v756_v48, %v553_v56  ;;  %v620_v3 = vadd.f32 %v756_v48, %v569_v57 }
 0x1e4   : > { %633 = vst [vmem:[%s211_s24 + $0x10] sm:$0xff] %v625_v60  ;;  %637 = vst [vmem:[%s211_s24 + $0x30] sm:$0xff] %v629_v61  ;;  %v626_v4 = vmax.f32 %v618_v62, 0.0  ;;  %v630_v5 = vmax.f32 %v622_v63, 0.0 }
 0x1e5   : > { %631 = vst [vmem:[%s211_s24] sm:$0xff] %v623_v0  ;;  %635 = vst [vmem:[%s211_s24 + $0x20] sm:$0xff] %v627_v1  ;;  %v624_v6 = vmax.f32 %v616_v2, 0.0  ;;  %v628_v7 = vmax.f32 %v620_v3, 0.0 }
 0x1e6   : > { %634 = vst [vmem:[%s211_s24 + $0x18] sm:$0xff] %v626_v4  ;;  %638 = vst [vmem:[%s211_s24 + $0x38] sm:$0xff] %v630_v5 }
 0x1e7   : > { %632 = vst [vmem:[%s211_s24 + $0x8] sm:$0xff] %v624_v6  ;;  %636 = vst [vmem:[%s211_s24 + $0x28] sm:$0xff] %v628_v7 }
 0x1e8   : > { %940 = shalt.err (!%p937_p5)
}
 0x1e9   : > { %s941_s10 = scalar_lea.hbm %s1180_s18, 1024  ;;  %s945_s13 = scalar_lea.hbm %s1236_s4, 2048 }
 0x1ea   : > { %p942_p6 = scmp.ne.s32.totalorder %s1180_s18, %s941_s10  ;;  %p946_p10 = scmp.lt.u32.totalorder %s1180_s18, %s1236_s4 }
 0x1eb   : > { %p947_p11 = scmp.lt.u32.totalorder %s945_s13, %s941_s10  ;;  %p949_p13 = scmp.lt.u32.totalorder %s941_s10, %s1180_s18 }
 0x1ec   : > { %p943_p7 = pnand %p942_p6, %p1075_p4 }
 0x1ed   : > { %p948_p12 = por %p947_p11, %p946_p10 }
 0x1ee   : > { %p944_p9 = pneg %p943_p7 }
 0x1ef   : > { %p950_p0 = por %p949_p13, %p948_p12 }
 0x1f1   : > { %p951_p1 = pnand %p950_p0, %p944_p9 }
 0x1f3   : > { %954 = shalt.err (!%p951_p1)
}
 0x1f4   : > { %s1008_s22 = smov 128   ;;  %s1009_s24 = smov 8  }
 0x1f5   : > { %865 = dma.vmem_to_hbm [thread:$0]  (%p1075_p4), %s1182_s26, 1024, %s1180_s18, %s1186_s5, %s1008_s22, %s1008_s22, %s1009_s24  }
 0x1f6 PF: > { %p871_p2 = scmp.ge.s32.totalorder %s1005_s20, 2  ;;  %s668_s29 = sand.u32 1, %s985_s15  }
 0x1f7   : > { %s669_s30 = scalar_lea.sflag [#allocation4], %s668_s29 }
 0x1f8   : > { %p868_p3 = pnand %p871_p2, %p1082_p8 }
 0x1fa   : > { %980 = dma.done.wait (!%p868_p3), %s669_s30, 1024  }
 0x1fb   : > { %982 = vsyncadd (!%p868_p3), %s669_s30, 4294966272  ;;  %s17_s20 = sadd.s32 1, %s1005_s20   ;;  %s1239_s15 = smov %s989_s16 }
 0x1fc   : > { %p14_p5 = scmp.ge.s32.totalorder %s17_s20, 4   ;;  %s1240_s16 = smov %s993_s17 }
 0x1fd   : > { %s1241_s17 = smov %s1088_s28  ;;  %s1242_s18 = smov %s1001_s19 }
 0x1fe   : > { %s1243_s19 = smov %s1245_s23  ;;  %16 = sbr.rel (!%p14_p5) target bundleno = 4 (0x4), region = 80 }
 0x205   :  { %674 = vsyncpa [#allocation4], 1 }
 0x206   :  { %676 = vsyncpa [#allocation4 + $0x1], 1 }

</bundles_post_ra>
